<compile_context>
chip_gen: v7x
topology: tpu7x:2x2x1
jax: 0.10.0
libtpu: 0.0.40
codegen_flags: <defaults>
</compile_context>

<pallas_src>
import numpy as np
import jax
import jax.numpy as jnp
from jax.experimental import pallas as pl
from jax.experimental.pallas import tpu as pltpu


# -----------------------------------------------------------------------------
# Pallas kernel
# -----------------------------------------------------------------------------
def make_glow_kernel(n_layers: int):
    def kernel(z0_ref, z1_ref,
               wt00_ref, wt01_ref, wt10_ref, wt11_ref,
               ba_ref, bb_ref,
               w1_ref, b1_ref,
               w2t_ref, b2t_ref, w2s_ref, b2s_ref,
               ldjc_ref,
               z0_out_ref, z1_out_ref, ldj_ref):
        cdt = wt00_ref.dtype                       # matmul-operand dtype (f32 or bf16)
        z0 = z0_ref[...].astype(jnp.float32)       # (TB, half)
        z1 = z1_ref[...].astype(jnp.float32)       # (TB, half)
        ldj = jnp.zeros((z0.shape[0], 1), jnp.float32)

        for i in range(n_layers):                  # static unroll (n_layers is small)
            # ---- fused ActNorm + InvertibleConv1x1 (block matmuls, no concat) ----
            z0c = z0.astype(cdt)
            z1c = z1.astype(cdt)
            a = (jnp.dot(z0c, wt00_ref[i], preferred_element_type=jnp.float32)
                 + jnp.dot(z1c, wt10_ref[i], preferred_element_type=jnp.float32)
                 + ba_ref[i])
            b = (jnp.dot(z0c, wt01_ref[i], preferred_element_type=jnp.float32)
                 + jnp.dot(z1c, wt11_ref[i], preferred_element_type=jnp.float32)
                 + bb_ref[i])

            # ---- AffineCoupling (halves never concatenated/sliced) ----
            odd = (i % 2 != 0)
            za, zb = (b, a) if odd else (a, b)

            h = jnp.dot(za.astype(cdt), w1_ref[i],
                        preferred_element_type=jnp.float32) + b1_ref[i]
            h = jnp.maximum(h, 0.0)                 # ReLU
            hc = h.astype(cdt)
            t = jnp.dot(hc, w2t_ref[i], preferred_element_type=jnp.float32) + b2t_ref[i]
            s = jnp.tanh(jnp.dot(hc, w2s_ref[i],
                                 preferred_element_type=jnp.float32) + b2s_ref[i])

            zb = zb * jnp.exp(s) + t                # elementwise kept in f32
            ldj = ldj + jnp.sum(s, axis=1, keepdims=True)

            z0, z1 = (zb, za) if odd else (za, zb)

        z0_out_ref[...] = z0.astype(z0_out_ref.dtype)
        z1_out_ref[...] = z1.astype(z1_out_ref.dtype)
        # single constant (sum over layers of sum(log_scale) + log|det W|), from SMEM
        ldj_ref[...] = ldj + ldjc_ref[0, 0]

    return kernel


# -----------------------------------------------------------------------------
# Wrapper: batch-gridded pallas_call
# -----------------------------------------------------------------------------
@jax.jit
def glow_forward(z, fused):
    """Full Glow stack in one pallas_call. Returns (z_out, log_df_dz)."""
    B, D = z.shape
    half = D // 2
    n_layers = fused["wt00"].shape[0]

    TB = B if B <= 512 else 512                    # batch tile (full B at toy sizes)
    grid = (pl.cdiv(B, TB),)

    z0 = z[:, :half].astype(jnp.float32)
    z1 = z[:, half:].astype(jnp.float32)
    ldjc = fused["ldj_const"].reshape(1, 1).astype(jnp.float32)

    def zspec():
        return pl.BlockSpec((TB, half), lambda b: (b, 0))

    def pspec(p):                                  # full-array, resident across blocks
        nd = p.ndim
        return pl.BlockSpec(p.shape, lambda b: (0,) * nd)

    param_order = ["wt00", "wt01", "wt10", "wt11", "ba", "bb",
                   "w1", "b1", "w2t", "b2t", "w2s", "b2s"]
    params_list = [fused[k] for k in param_order]

    in_specs = (
        [zspec(), zspec()]
        + [pspec(p) for p in params_list]
        + [pl.BlockSpec((1, 1), lambda b: (0, 0),
                        memory_space=pltpu.MemorySpace.SMEM)]
    )
    out_specs = (zspec(), zspec(), pl.BlockSpec((TB, 1), lambda b: (b, 0)))
    out_shape = (jax.ShapeDtypeStruct((B, half), jnp.float32),
                 jax.ShapeDtypeStruct((B, half), jnp.float32),
                 jax.ShapeDtypeStruct((B, 1), jnp.float32))

    z0o, z1o, ldj = pl.pallas_call(
        make_glow_kernel(n_layers),
        grid=grid,
        in_specs=in_specs,
        out_specs=out_specs,
        out_shape=out_shape,
        input_output_aliases={0: 0, 1: 1},          # z halves updated in place
        compiler_params=pltpu.CompilerParams(
            dimension_semantics=("parallel",)),     # megacore on v7x, no-op on v5e/v6e
    )(z0, z1, *params_list, ldjc)

    z_out = jnp.concatenate([z0o, z1o], axis=1)
    return z_out, ldj.reshape(B)


# -----------------------------------------------------------------------------
# Pure-JAX reference (original UNFUSED module semantics) for correctness check
# -----------------------------------------------------------------------------
def glow_forward_ref(z, raw):
    B, D = z.shape
    half = D // 2
    n_layers = raw["log_scales"].shape[0]
    z = z.astype(jnp.float32)
    ldj = jnp.zeros((B,), jnp.float32)
    for i in range(n_layers):
        ls = raw["log_scales"][i]
        z = z * jnp.exp(ls) + raw["biases"][i]
        ldj = ldj + jnp.sum(ls)
        w = raw["w"][i]
        z = z @ w.T
        ldj = ldj + jnp.linalg.slogdet(w)[1]
        odd = (i % 2 != 0)
        z0, z1 = z[:, :half], z[:, half:]
        za, zb = (z1, z0) if odd else (z0, z1)
        h = jnp.maximum(za @ raw["w1"][i] + raw["b1"][i], 0.0)
        p = h @ raw["w2"][i] + raw["b2"][i]
        t, s = p[:, :half], jnp.tanh(p[:, half:])
        zb = zb * jnp.exp(s) + t
        ldj = ldj + jnp.sum(s, axis=1)
        z = jnp.concatenate([zb, za], axis=1) if odd else jnp.concatenate([za, zb], axis=1)
    return z, ldj


# -----------------------------------------------------------------------------
# Deterministic parameter construction + host-side constant folding
# -----------------------------------------------------------------------------
def init_raw_params(key, n_layers, D, H):
    half = D // 2
    ks = jax.random.split(key, 7)
    log_scales = 0.1 * jax.random.normal(ks[0], (n_layers, 1, D), jnp.float32)
    biases = 0.1 * jax.random.normal(ks[1], (n_layers, 1, D), jnp.float32)
    raw = jax.random.normal(ks[2], (n_layers, D, D), jnp.float32)
    w = jnp.stack([jnp.linalg.qr(raw[i])[0] for i in range(n_layers)], axis=0)
    w1 = jax.random.normal(ks[3], (n_layers, half, H), jnp.float32) / np.sqrt(half)
    b1 = 0.01 * jax.random.normal(ks[4], (n_layers, 1, H), jnp.float32)
    w2 = 0.05 * jax.random.normal(ks[5], (n_layers, H, D), jnp.float32)
    b2 = 0.01 * jax.random.normal(ks[6], (n_layers, 1, D), jnp.float32)
    return dict(log_scales=log_scales, biases=biases, w=w, w1=w1, b1=b1, w2=w2, b2=b2)


def fuse_params(raw, weight_dtype=jnp.float32):
    """Fold ActNorm into the 1x1 conv, fold constant log-det terms, pre-split halves.

    All folding is done in f32; only the matmul weights are (optionally) cast to
    `weight_dtype` (bf16 on v6e/v7x); biases / log-det constant stay f32.
    """
    ls, b, w = raw["log_scales"], raw["biases"], raw["w"]
    L, _, D = ls.shape
    half = D // 2

    wt = jnp.swapaxes(w, 1, 2)                               # (L, D, D) == W^T per layer
    wt_f = jnp.swapaxes(jnp.exp(ls), 1, 2) * wt              # diag(exp(ls)) @ W^T  (f32)
    bias_f = jnp.matmul(b, wt)                               # bias @ W^T           (f32)

    logdets = jnp.stack([jnp.linalg.slogdet(w[i])[1] for i in range(L)], axis=0)
    ldj_const = (jnp.sum(ls) + jnp.sum(logdets)).astype(jnp.float32)

    cast = lambda x: x.astype(weight_dtype)
    return dict(
        # blocks derived from the ALREADY-FUSED W^T (fold and split agree)
        wt00=cast(wt_f[:, :half, :half]), wt01=cast(wt_f[:, :half, half:]),
        wt10=cast(wt_f[:, half:, :half]), wt11=cast(wt_f[:, half:, half:]),
        ba=bias_f[:, :, :half].astype(jnp.float32),
        bb=bias_f[:, :, half:].astype(jnp.float32),
        w1=cast(raw["w1"]), b1=raw["b1"].astype(jnp.float32),
        w2t=cast(raw["w2"][:, :, :half]), b2t=raw["b2"][:, :, :half].astype(jnp.float32),
        w2s=cast(raw["w2"][:, :, half:]), b2s=raw["b2"][:, :, half:].astype(jnp.float32),
        ldj_const=ldj_const,
    )


# -----------------------------------------------------------------------------
if __name__ == "__main__":
    B, D, H = 8, 32, 64          # dims = (32,), batch 8, coupling-MLP hidden 64
    n_layers = 3                 # cfg.layers = 3

    key = jax.random.PRNGKey(0)
    k_z, k_p = jax.random.split(key)
    z = jax.random.normal(k_z, (B, D), jnp.float32)
    raw = init_raw_params(k_p, n_layers, D, H)

    # --- f32 weights: tight check against the original (unfused) semantics ---
    fused_f32 = fuse_params(raw, weight_dtype=jnp.float32)
    z_out, log_df_dz = glow_forward(z, fused_f32)
    jax.block_until_ready((z_out, log_df_dz))

    z_ref, ldj_ref = glow_forward_ref(z, raw)
    assert z_out.shape == (B, D) and log_df_dz.shape == (B,)
    np.testing.assert_allclose(np.asarray(z_out), np.asarray(z_ref), rtol=2e-4, atol=2e-4)
    np.testing.assert_allclose(np.asarray(log_df_dz), np.asarray(ldj_ref), rtol=2e-4, atol=2e-4)

    # --- bf16 weights (v6e/v7x MXU & VMEM win), f32 accumulation + elementwise ---
    fused_bf16 = fuse_params(raw, weight_dtype=jnp.bfloat16)
    z_bf, ldj_bf = glow_forward(z, fused_bf16)
    jax.block_until_ready((z_bf, ldj_bf))
    assert bool(jnp.all(jnp.isfinite(z_bf))) and bool(jnp.all(jnp.isfinite(ldj_bf)))

    print("KERNEL_OK")
</pallas_src>

<mosaic_0001>
module attributes {stable_mosaic.version = 11 : i64} {
  func.func @kernel(%arg0: i32, %arg1: memref<8x16xf32, #tpu.memory_space<vmem>>, %arg2: memref<8x16xf32, #tpu.memory_space<vmem>>, %arg3: memref<3x16x16xf32, #tpu.memory_space<vmem>>, %arg4: memref<3x16x16xf32, #tpu.memory_space<vmem>>, %arg5: memref<3x16x16xf32, #tpu.memory_space<vmem>>, %arg6: memref<3x16x16xf32, #tpu.memory_space<vmem>>, %arg7: memref<3x1x16xf32, #tpu.memory_space<vmem>>, %arg8: memref<3x1x16xf32, #tpu.memory_space<vmem>>, %arg9: memref<3x16x64xf32, #tpu.memory_space<vmem>>, %arg10: memref<3x1x64xf32, #tpu.memory_space<vmem>>, %arg11: memref<3x64x16xf32, #tpu.memory_space<vmem>>, %arg12: memref<3x1x16xf32, #tpu.memory_space<vmem>>, %arg13: memref<3x64x16xf32, #tpu.memory_space<vmem>>, %arg14: memref<3x1x16xf32, #tpu.memory_space<vmem>>, %arg15: memref<1x1xf32, #tpu.memory_space<smem>>, %arg16: memref<8x16xf32, #tpu.memory_space<vmem>>, %arg17: memref<8x16xf32, #tpu.memory_space<vmem>>, %arg18: memref<8x1xf32, #tpu.memory_space<vmem>>) attributes {dimension_semantics = [#tpu.dimension_semantics<parallel>], iteration_bounds = array<i64: 1>, scalar_prefetch = 0 : i64, scratch_operands = 0 : i64, tpu.core_type = #tpu.core_type<tc>, window_params = [{transform_indices = @transform_0, window_bounds = array<i64: 8, 16>}, {transform_indices = @transform_1, window_bounds = array<i64: 8, 16>}, {pipeline_mode = #tpu.pipeline_mode<synchronous>, transform_indices = @transform_2, window_bounds = array<i64: 3, 16, 16>}, {pipeline_mode = #tpu.pipeline_mode<synchronous>, transform_indices = @transform_3, window_bounds = array<i64: 3, 16, 16>}, {pipeline_mode = #tpu.pipeline_mode<synchronous>, transform_indices = @transform_4, window_bounds = array<i64: 3, 16, 16>}, {pipeline_mode = #tpu.pipeline_mode<synchronous>, transform_indices = @transform_5, window_bounds = array<i64: 3, 16, 16>}, {pipeline_mode = #tpu.pipeline_mode<synchronous>, transform_indices = @transform_6, window_bounds = array<i64: 3, 1, 16>}, {pipeline_mode = #tpu.pipeline_mode<synchronous>, transform_indices = @transform_7, window_bounds = array<i64: 3, 1, 16>}, {pipeline_mode = #tpu.pipeline_mode<synchronous>, transform_indices = @transform_8, window_bounds = array<i64: 3, 16, 64>}, {pipeline_mode = #tpu.pipeline_mode<synchronous>, transform_indices = @transform_9, window_bounds = array<i64: 3, 1, 64>}, {pipeline_mode = #tpu.pipeline_mode<synchronous>, transform_indices = @transform_10, window_bounds = array<i64: 3, 64, 16>}, {pipeline_mode = #tpu.pipeline_mode<synchronous>, transform_indices = @transform_11, window_bounds = array<i64: 3, 1, 16>}, {pipeline_mode = #tpu.pipeline_mode<synchronous>, transform_indices = @transform_12, window_bounds = array<i64: 3, 64, 16>}, {pipeline_mode = #tpu.pipeline_mode<synchronous>, transform_indices = @transform_13, window_bounds = array<i64: 3, 1, 16>}, {transform_indices = @transform_14, window_bounds = array<i64: 1, 1>}, {transform_indices = @transform_15, window_bounds = array<i64: 8, 16>}, {transform_indices = @transform_16, window_bounds = array<i64: 8, 16>}, {transform_indices = @transform_17, window_bounds = array<i64: 8, 1>}]} {
    %c0 = arith.constant 0 : index
    %c0_0 = arith.constant 0 : index
    %0 = vector.load %arg1[%c0, %c0_0] : memref<8x16xf32, #tpu.memory_space<vmem>>, vector<8x16xf32>
    %c0_1 = arith.constant 0 : index
    %c0_2 = arith.constant 0 : index
    %1 = vector.load %arg2[%c0_1, %c0_2] : memref<8x16xf32, #tpu.memory_space<vmem>>, vector<8x16xf32>
    %cst = arith.constant 0.000000e+00 : f32
    %2 = vector.broadcast %cst : f32 to vector<8x1xf32>
    %c0_3 = arith.constant 0 : index
    %c0_4 = arith.constant 0 : index
    %c0_5 = arith.constant 0 : index
    %3 = vector.load %arg3[%c0_3, %c0_4, %c0_5] : memref<3x16x16xf32, #tpu.memory_space<vmem>>, vector<1x16x16xf32>
    %4 = vector.shape_cast %3 : vector<1x16x16xf32> to vector<16x16xf32>
    %cst_6 = arith.constant dense<0.000000e+00> : vector<8x16xf32>
    %5 = tpu.matmul %0, %4, %cst_6 {dimension_numbers = #tpu.dot_dimension_numbers<[1], [0], [0], [1], [0, 0, 1, 1], [], []>} : vector<8x16xf32>, vector<16x16xf32>, vector<8x16xf32> -> vector<8x16xf32>
    %c0_7 = arith.constant 0 : index
    %c0_8 = arith.constant 0 : index
    %c0_9 = arith.constant 0 : index
    %6 = vector.load %arg5[%c0_7, %c0_8, %c0_9] : memref<3x16x16xf32, #tpu.memory_space<vmem>>, vector<1x16x16xf32>
    %7 = vector.shape_cast %6 : vector<1x16x16xf32> to vector<16x16xf32>
    %cst_10 = arith.constant dense<0.000000e+00> : vector<8x16xf32>
    %8 = tpu.matmul %1, %7, %cst_10 {dimension_numbers = #tpu.dot_dimension_numbers<[1], [0], [0], [1], [0, 0, 1, 1], [], []>} : vector<8x16xf32>, vector<16x16xf32>, vector<8x16xf32> -> vector<8x16xf32>
    %9 = arith.addf %5, %8 : vector<8x16xf32>
    %c0_11 = arith.constant 0 : index
    %c0_12 = arith.constant 0 : index
    %c0_13 = arith.constant 0 : index
    %10 = vector.load %arg7[%c0_11, %c0_12, %c0_13] : memref<3x1x16xf32, #tpu.memory_space<vmem>>, vector<1x1x16xf32>
    %11 = vector.shape_cast %10 : vector<1x1x16xf32> to vector<1x16xf32>
    %12 = vector.broadcast %11 : vector<1x16xf32> to vector<8x16xf32>
    %13 = arith.addf %9, %12 : vector<8x16xf32>
    %c0_14 = arith.constant 0 : index
    %c0_15 = arith.constant 0 : index
    %c0_16 = arith.constant 0 : index
    %14 = vector.load %arg4[%c0_14, %c0_15, %c0_16] : memref<3x16x16xf32, #tpu.memory_space<vmem>>, vector<1x16x16xf32>
    %15 = vector.shape_cast %14 : vector<1x16x16xf32> to vector<16x16xf32>
    %cst_17 = arith.constant dense<0.000000e+00> : vector<8x16xf32>
    %16 = tpu.matmul %0, %15, %cst_17 {dimension_numbers = #tpu.dot_dimension_numbers<[1], [0], [0], [1], [0, 0, 1, 1], [], []>} : vector<8x16xf32>, vector<16x16xf32>, vector<8x16xf32> -> vector<8x16xf32>
    %c0_18 = arith.constant 0 : index
    %c0_19 = arith.constant 0 : index
    %c0_20 = arith.constant 0 : index
    %17 = vector.load %arg6[%c0_18, %c0_19, %c0_20] : memref<3x16x16xf32, #tpu.memory_space<vmem>>, vector<1x16x16xf32>
    %18 = vector.shape_cast %17 : vector<1x16x16xf32> to vector<16x16xf32>
    %cst_21 = arith.constant dense<0.000000e+00> : vector<8x16xf32>
    %19 = tpu.matmul %1, %18, %cst_21 {dimension_numbers = #tpu.dot_dimension_numbers<[1], [0], [0], [1], [0, 0, 1, 1], [], []>} : vector<8x16xf32>, vector<16x16xf32>, vector<8x16xf32> -> vector<8x16xf32>
    %20 = arith.addf %16, %19 : vector<8x16xf32>
    %c0_22 = arith.constant 0 : index
    %c0_23 = arith.constant 0 : index
    %c0_24 = arith.constant 0 : index
    %21 = vector.load %arg8[%c0_22, %c0_23, %c0_24] : memref<3x1x16xf32, #tpu.memory_space<vmem>>, vector<1x1x16xf32>
    %22 = vector.shape_cast %21 : vector<1x1x16xf32> to vector<1x16xf32>
    %23 = vector.broadcast %22 : vector<1x16xf32> to vector<8x16xf32>
    %24 = arith.addf %20, %23 : vector<8x16xf32>
    %c0_25 = arith.constant 0 : index
    %c0_26 = arith.constant 0 : index
    %c0_27 = arith.constant 0 : index
    %25 = vector.load %arg9[%c0_25, %c0_26, %c0_27] : memref<3x16x64xf32, #tpu.memory_space<vmem>>, vector<1x16x64xf32>
    %26 = vector.shape_cast %25 : vector<1x16x64xf32> to vector<16x64xf32>
    %cst_28 = arith.constant dense<0.000000e+00> : vector<8x64xf32>
    %27 = tpu.matmul %13, %26, %cst_28 {dimension_numbers = #tpu.dot_dimension_numbers<[1], [0], [0], [1], [0, 0, 1, 1], [], []>} : vector<8x16xf32>, vector<16x64xf32>, vector<8x64xf32> -> vector<8x64xf32>
    %c0_29 = arith.constant 0 : index
    %c0_30 = arith.constant 0 : index
    %c0_31 = arith.constant 0 : index
    %28 = vector.load %arg10[%c0_29, %c0_30, %c0_31] : memref<3x1x64xf32, #tpu.memory_space<vmem>>, vector<1x1x64xf32>
    %29 = vector.shape_cast %28 : vector<1x1x64xf32> to vector<1x64xf32>
    %30 = vector.broadcast %29 : vector<1x64xf32> to vector<8x64xf32>
    %31 = arith.addf %27, %30 : vector<8x64xf32>
    %cst_32 = arith.constant 0.000000e+00 : f32
    %32 = vector.broadcast %cst_32 : f32 to vector<8x64xf32>
    %33 = arith.maximumf %31, %32 : vector<8x64xf32>
    %c0_33 = arith.constant 0 : index
    %c0_34 = arith.constant 0 : index
    %c0_35 = arith.constant 0 : index
    %34 = vector.load %arg11[%c0_33, %c0_34, %c0_35] : memref<3x64x16xf32, #tpu.memory_space<vmem>>, vector<1x64x16xf32>
    %35 = vector.shape_cast %34 : vector<1x64x16xf32> to vector<64x16xf32>
    %cst_36 = arith.constant dense<0.000000e+00> : vector<8x16xf32>
    %36 = tpu.matmul %33, %35, %cst_36 {dimension_numbers = #tpu.dot_dimension_numbers<[1], [0], [0], [1], [0, 0, 1, 1], [], []>} : vector<8x64xf32>, vector<64x16xf32>, vector<8x16xf32> -> vector<8x16xf32>
    %c0_37 = arith.constant 0 : index
    %c0_38 = arith.constant 0 : index
    %c0_39 = arith.constant 0 : index
    %37 = vector.load %arg12[%c0_37, %c0_38, %c0_39] : memref<3x1x16xf32, #tpu.memory_space<vmem>>, vector<1x1x16xf32>
    %38 = vector.shape_cast %37 : vector<1x1x16xf32> to vector<1x16xf32>
    %39 = vector.broadcast %38 : vector<1x16xf32> to vector<8x16xf32>
    %40 = arith.addf %36, %39 : vector<8x16xf32>
    %c0_40 = arith.constant 0 : index
    %c0_41 = arith.constant 0 : index
    %c0_42 = arith.constant 0 : index
    %41 = vector.load %arg13[%c0_40, %c0_41, %c0_42] : memref<3x64x16xf32, #tpu.memory_space<vmem>>, vector<1x64x16xf32>
    %42 = vector.shape_cast %41 : vector<1x64x16xf32> to vector<64x16xf32>
    %cst_43 = arith.constant dense<0.000000e+00> : vector<8x16xf32>
    %43 = tpu.matmul %33, %42, %cst_43 {dimension_numbers = #tpu.dot_dimension_numbers<[1], [0], [0], [1], [0, 0, 1, 1], [], []>} : vector<8x64xf32>, vector<64x16xf32>, vector<8x16xf32> -> vector<8x16xf32>
    %c0_44 = arith.constant 0 : index
    %c0_45 = arith.constant 0 : index
    %c0_46 = arith.constant 0 : index
    %44 = vector.load %arg14[%c0_44, %c0_45, %c0_46] : memref<3x1x16xf32, #tpu.memory_space<vmem>>, vector<1x1x16xf32>
    %45 = vector.shape_cast %44 : vector<1x1x16xf32> to vector<1x16xf32>
    %46 = vector.broadcast %45 : vector<1x16xf32> to vector<8x16xf32>
    %47 = arith.addf %43, %46 : vector<8x16xf32>
    %48 = math.tanh %47 : vector<8x16xf32>
    %49 = math.exp %48 : vector<8x16xf32>
    %50 = arith.mulf %24, %49 : vector<8x16xf32>
    %51 = arith.addf %50, %40 : vector<8x16xf32>
    %cst_47 = arith.constant dense<0.000000e+00> : vector<8xf32>
    %52 = vector.multi_reduction <add>, %48, %cst_47 [1] : vector<8x16xf32> to vector<8xf32>
    %53 = vector.shape_cast %52 : vector<8xf32> to vector<8x1xf32>
    %54 = arith.addf %2, %53 : vector<8x1xf32>
    %c1 = arith.constant 1 : index
    %c0_48 = arith.constant 0 : index
    %c0_49 = arith.constant 0 : index
    %55 = vector.load %arg3[%c1, %c0_48, %c0_49] : memref<3x16x16xf32, #tpu.memory_space<vmem>>, vector<1x16x16xf32>
    %56 = vector.shape_cast %55 : vector<1x16x16xf32> to vector<16x16xf32>
    %cst_50 = arith.constant dense<0.000000e+00> : vector<8x16xf32>
    %57 = tpu.matmul %13, %56, %cst_50 {dimension_numbers = #tpu.dot_dimension_numbers<[1], [0], [0], [1], [0, 0, 1, 1], [], []>} : vector<8x16xf32>, vector<16x16xf32>, vector<8x16xf32> -> vector<8x16xf32>
    %c1_51 = arith.constant 1 : index
    %c0_52 = arith.constant 0 : index
    %c0_53 = arith.constant 0 : index
    %58 = vector.load %arg5[%c1_51, %c0_52, %c0_53] : memref<3x16x16xf32, #tpu.memory_space<vmem>>, vector<1x16x16xf32>
    %59 = vector.shape_cast %58 : vector<1x16x16xf32> to vector<16x16xf32>
    %cst_54 = arith.constant dense<0.000000e+00> : vector<8x16xf32>
    %60 = tpu.matmul %51, %59, %cst_54 {dimension_numbers = #tpu.dot_dimension_numbers<[1], [0], [0], [1], [0, 0, 1, 1], [], []>} : vector<8x16xf32>, vector<16x16xf32>, vector<8x16xf32> -> vector<8x16xf32>
    %61 = arith.addf %57, %60 : vector<8x16xf32>
    %c1_55 = arith.constant 1 : index
    %c0_56 = arith.constant 0 : index
    %c0_57 = arith.constant 0 : index
    %62 = vector.load %arg7[%c1_55, %c0_56, %c0_57] : memref<3x1x16xf32, #tpu.memory_space<vmem>>, vector<1x1x16xf32>
    %63 = vector.shape_cast %62 : vector<1x1x16xf32> to vector<1x16xf32>
    %64 = vector.broadcast %63 : vector<1x16xf32> to vector<8x16xf32>
    %65 = arith.addf %61, %64 : vector<8x16xf32>
    %c1_58 = arith.constant 1 : index
    %c0_59 = arith.constant 0 : index
    %c0_60 = arith.constant 0 : index
    %66 = vector.load %arg4[%c1_58, %c0_59, %c0_60] : memref<3x16x16xf32, #tpu.memory_space<vmem>>, vector<1x16x16xf32>
    %67 = vector.shape_cast %66 : vector<1x16x16xf32> to vector<16x16xf32>
    %cst_61 = arith.constant dense<0.000000e+00> : vector<8x16xf32>
    %68 = tpu.matmul %13, %67, %cst_61 {dimension_numbers = #tpu.dot_dimension_numbers<[1], [0], [0], [1], [0, 0, 1, 1], [], []>} : vector<8x16xf32>, vector<16x16xf32>, vector<8x16xf32> -> vector<8x16xf32>
    %c1_62 = arith.constant 1 : index
    %c0_63 = arith.constant 0 : index
    %c0_64 = arith.constant 0 : index
    %69 = vector.load %arg6[%c1_62, %c0_63, %c0_64] : memref<3x16x16xf32, #tpu.memory_space<vmem>>, vector<1x16x16xf32>
    %70 = vector.shape_cast %69 : vector<1x16x16xf32> to vector<16x16xf32>
    %cst_65 = arith.constant dense<0.000000e+00> : vector<8x16xf32>
    %71 = tpu.matmul %51, %70, %cst_65 {dimension_numbers = #tpu.dot_dimension_numbers<[1], [0], [0], [1], [0, 0, 1, 1], [], []>} : vector<8x16xf32>, vector<16x16xf32>, vector<8x16xf32> -> vector<8x16xf32>
    %72 = arith.addf %68, %71 : vector<8x16xf32>
    %c1_66 = arith.constant 1 : index
    %c0_67 = arith.constant 0 : index
    %c0_68 = arith.constant 0 : index
    %73 = vector.load %arg8[%c1_66, %c0_67, %c0_68] : memref<3x1x16xf32, #tpu.memory_space<vmem>>, vector<1x1x16xf32>
    %74 = vector.shape_cast %73 : vector<1x1x16xf32> to vector<1x16xf32>
    %75 = vector.broadcast %74 : vector<1x16xf32> to vector<8x16xf32>
    %76 = arith.addf %72, %75 : vector<8x16xf32>
    %c1_69 = arith.constant 1 : index
    %c0_70 = arith.constant 0 : index
    %c0_71 = arith.constant 0 : index
    %77 = vector.load %arg9[%c1_69, %c0_70, %c0_71] : memref<3x16x64xf32, #tpu.memory_space<vmem>>, vector<1x16x64xf32>
    %78 = vector.shape_cast %77 : vector<1x16x64xf32> to vector<16x64xf32>
    %cst_72 = arith.constant dense<0.000000e+00> : vector<8x64xf32>
    %79 = tpu.matmul %76, %78, %cst_72 {dimension_numbers = #tpu.dot_dimension_numbers<[1], [0], [0], [1], [0, 0, 1, 1], [], []>} : vector<8x16xf32>, vector<16x64xf32>, vector<8x64xf32> -> vector<8x64xf32>
    %c1_73 = arith.constant 1 : index
    %c0_74 = arith.constant 0 : index
    %c0_75 = arith.constant 0 : index
    %80 = vector.load %arg10[%c1_73, %c0_74, %c0_75] : memref<3x1x64xf32, #tpu.memory_space<vmem>>, vector<1x1x64xf32>
    %81 = vector.shape_cast %80 : vector<1x1x64xf32> to vector<1x64xf32>
    %82 = vector.broadcast %81 : vector<1x64xf32> to vector<8x64xf32>
    %83 = arith.addf %79, %82 : vector<8x64xf32>
    %cst_76 = arith.constant 0.000000e+00 : f32
    %84 = vector.broadcast %cst_76 : f32 to vector<8x64xf32>
    %85 = arith.maximumf %83, %84 : vector<8x64xf32>
    %c1_77 = arith.constant 1 : index
    %c0_78 = arith.constant 0 : index
    %c0_79 = arith.constant 0 : index
    %86 = vector.load %arg11[%c1_77, %c0_78, %c0_79] : memref<3x64x16xf32, #tpu.memory_space<vmem>>, vector<1x64x16xf32>
    %87 = vector.shape_cast %86 : vector<1x64x16xf32> to vector<64x16xf32>
    %cst_80 = arith.constant dense<0.000000e+00> : vector<8x16xf32>
    %88 = tpu.matmul %85, %87, %cst_80 {dimension_numbers = #tpu.dot_dimension_numbers<[1], [0], [0], [1], [0, 0, 1, 1], [], []>} : vector<8x64xf32>, vector<64x16xf32>, vector<8x16xf32> -> vector<8x16xf32>
    %c1_81 = arith.constant 1 : index
    %c0_82 = arith.constant 0 : index
    %c0_83 = arith.constant 0 : index
    %89 = vector.load %arg12[%c1_81, %c0_82, %c0_83] : memref<3x1x16xf32, #tpu.memory_space<vmem>>, vector<1x1x16xf32>
    %90 = vector.shape_cast %89 : vector<1x1x16xf32> to vector<1x16xf32>
    %91 = vector.broadcast %90 : vector<1x16xf32> to vector<8x16xf32>
    %92 = arith.addf %88, %91 : vector<8x16xf32>
    %c1_84 = arith.constant 1 : index
    %c0_85 = arith.constant 0 : index
    %c0_86 = arith.constant 0 : index
    %93 = vector.load %arg13[%c1_84, %c0_85, %c0_86] : memref<3x64x16xf32, #tpu.memory_space<vmem>>, vector<1x64x16xf32>
    %94 = vector.shape_cast %93 : vector<1x64x16xf32> to vector<64x16xf32>
    %cst_87 = arith.constant dense<0.000000e+00> : vector<8x16xf32>
    %95 = tpu.matmul %85, %94, %cst_87 {dimension_numbers = #tpu.dot_dimension_numbers<[1], [0], [0], [1], [0, 0, 1, 1], [], []>} : vector<8x64xf32>, vector<64x16xf32>, vector<8x16xf32> -> vector<8x16xf32>
    %c1_88 = arith.constant 1 : index
    %c0_89 = arith.constant 0 : index
    %c0_90 = arith.constant 0 : index
    %96 = vector.load %arg14[%c1_88, %c0_89, %c0_90] : memref<3x1x16xf32, #tpu.memory_space<vmem>>, vector<1x1x16xf32>
    %97 = vector.shape_cast %96 : vector<1x1x16xf32> to vector<1x16xf32>
    %98 = vector.broadcast %97 : vector<1x16xf32> to vector<8x16xf32>
    %99 = arith.addf %95, %98 : vector<8x16xf32>
    %100 = math.tanh %99 : vector<8x16xf32>
    %101 = math.exp %100 : vector<8x16xf32>
    %102 = arith.mulf %65, %101 : vector<8x16xf32>
    %103 = arith.addf %102, %92 : vector<8x16xf32>
    %cst_91 = arith.constant dense<0.000000e+00> : vector<8xf32>
    %104 = vector.multi_reduction <add>, %100, %cst_91 [1] : vector<8x16xf32> to vector<8xf32>
    %105 = vector.shape_cast %104 : vector<8xf32> to vector<8x1xf32>
    %106 = arith.addf %54, %105 : vector<8x1xf32>
    %c2 = arith.constant 2 : index
    %c0_92 = arith.constant 0 : index
    %c0_93 = arith.constant 0 : index
    %107 = vector.load %arg3[%c2, %c0_92, %c0_93] : memref<3x16x16xf32, #tpu.memory_space<vmem>>, vector<1x16x16xf32>
    %108 = vector.shape_cast %107 : vector<1x16x16xf32> to vector<16x16xf32>
    %cst_94 = arith.constant dense<0.000000e+00> : vector<8x16xf32>
    %109 = tpu.matmul %103, %108, %cst_94 {dimension_numbers = #tpu.dot_dimension_numbers<[1], [0], [0], [1], [0, 0, 1, 1], [], []>} : vector<8x16xf32>, vector<16x16xf32>, vector<8x16xf32> -> vector<8x16xf32>
    %c2_95 = arith.constant 2 : index
    %c0_96 = arith.constant 0 : index
    %c0_97 = arith.constant 0 : index
    %110 = vector.load %arg5[%c2_95, %c0_96, %c0_97] : memref<3x16x16xf32, #tpu.memory_space<vmem>>, vector<1x16x16xf32>
    %111 = vector.shape_cast %110 : vector<1x16x16xf32> to vector<16x16xf32>
    %cst_98 = arith.constant dense<0.000000e+00> : vector<8x16xf32>
    %112 = tpu.matmul %76, %111, %cst_98 {dimension_numbers = #tpu.dot_dimension_numbers<[1], [0], [0], [1], [0, 0, 1, 1], [], []>} : vector<8x16xf32>, vector<16x16xf32>, vector<8x16xf32> -> vector<8x16xf32>
    %113 = arith.addf %109, %112 : vector<8x16xf32>
    %c2_99 = arith.constant 2 : index
    %c0_100 = arith.constant 0 : index
    %c0_101 = arith.constant 0 : index
    %114 = vector.load %arg7[%c2_99, %c0_100, %c0_101] : memref<3x1x16xf32, #tpu.memory_space<vmem>>, vector<1x1x16xf32>
    %115 = vector.shape_cast %114 : vector<1x1x16xf32> to vector<1x16xf32>
    %116 = vector.broadcast %115 : vector<1x16xf32> to vector<8x16xf32>
    %117 = arith.addf %113, %116 : vector<8x16xf32>
    %c2_102 = arith.constant 2 : index
    %c0_103 = arith.constant 0 : index
    %c0_104 = arith.constant 0 : index
    %118 = vector.load %arg4[%c2_102, %c0_103, %c0_104] : memref<3x16x16xf32, #tpu.memory_space<vmem>>, vector<1x16x16xf32>
    %119 = vector.shape_cast %118 : vector<1x16x16xf32> to vector<16x16xf32>
    %cst_105 = arith.constant dense<0.000000e+00> : vector<8x16xf32>
    %120 = tpu.matmul %103, %119, %cst_105 {dimension_numbers = #tpu.dot_dimension_numbers<[1], [0], [0], [1], [0, 0, 1, 1], [], []>} : vector<8x16xf32>, vector<16x16xf32>, vector<8x16xf32> -> vector<8x16xf32>
    %c2_106 = arith.constant 2 : index
    %c0_107 = arith.constant 0 : index
    %c0_108 = arith.constant 0 : index
    %121 = vector.load %arg6[%c2_106, %c0_107, %c0_108] : memref<3x16x16xf32, #tpu.memory_space<vmem>>, vector<1x16x16xf32>
    %122 = vector.shape_cast %121 : vector<1x16x16xf32> to vector<16x16xf32>
    %cst_109 = arith.constant dense<0.000000e+00> : vector<8x16xf32>
    %123 = tpu.matmul %76, %122, %cst_109 {dimension_numbers = #tpu.dot_dimension_numbers<[1], [0], [0], [1], [0, 0, 1, 1], [], []>} : vector<8x16xf32>, vector<16x16xf32>, vector<8x16xf32> -> vector<8x16xf32>
    %124 = arith.addf %120, %123 : vector<8x16xf32>
    %c2_110 = arith.constant 2 : index
    %c0_111 = arith.constant 0 : index
    %c0_112 = arith.constant 0 : index
    %125 = vector.load %arg8[%c2_110, %c0_111, %c0_112] : memref<3x1x16xf32, #tpu.memory_space<vmem>>, vector<1x1x16xf32>
    %126 = vector.shape_cast %125 : vector<1x1x16xf32> to vector<1x16xf32>
    %127 = vector.broadcast %126 : vector<1x16xf32> to vector<8x16xf32>
    %128 = arith.addf %124, %127 : vector<8x16xf32>
    %c2_113 = arith.constant 2 : index
    %c0_114 = arith.constant 0 : index
    %c0_115 = arith.constant 0 : index
    %129 = vector.load %arg9[%c2_113, %c0_114, %c0_115] : memref<3x16x64xf32, #tpu.memory_space<vmem>>, vector<1x16x64xf32>
    %130 = vector.shape_cast %129 : vector<1x16x64xf32> to vector<16x64xf32>
    %cst_116 = arith.constant dense<0.000000e+00> : vector<8x64xf32>
    %131 = tpu.matmul %117, %130, %cst_116 {dimension_numbers = #tpu.dot_dimension_numbers<[1], [0], [0], [1], [0, 0, 1, 1], [], []>} : vector<8x16xf32>, vector<16x64xf32>, vector<8x64xf32> -> vector<8x64xf32>
    %c2_117 = arith.constant 2 : index
    %c0_118 = arith.constant 0 : index
    %c0_119 = arith.constant 0 : index
    %132 = vector.load %arg10[%c2_117, %c0_118, %c0_119] : memref<3x1x64xf32, #tpu.memory_space<vmem>>, vector<1x1x64xf32>
    %133 = vector.shape_cast %132 : vector<1x1x64xf32> to vector<1x64xf32>
    %134 = vector.broadcast %133 : vector<1x64xf32> to vector<8x64xf32>
    %135 = arith.addf %131, %134 : vector<8x64xf32>
    %cst_120 = arith.constant 0.000000e+00 : f32
    %136 = vector.broadcast %cst_120 : f32 to vector<8x64xf32>
    %137 = arith.maximumf %135, %136 : vector<8x64xf32>
    %c2_121 = arith.constant 2 : index
    %c0_122 = arith.constant 0 : index
    %c0_123 = arith.constant 0 : index
    %138 = vector.load %arg11[%c2_121, %c0_122, %c0_123] : memref<3x64x16xf32, #tpu.memory_space<vmem>>, vector<1x64x16xf32>
    %139 = vector.shape_cast %138 : vector<1x64x16xf32> to vector<64x16xf32>
    %cst_124 = arith.constant dense<0.000000e+00> : vector<8x16xf32>
    %140 = tpu.matmul %137, %139, %cst_124 {dimension_numbers = #tpu.dot_dimension_numbers<[1], [0], [0], [1], [0, 0, 1, 1], [], []>} : vector<8x64xf32>, vector<64x16xf32>, vector<8x16xf32> -> vector<8x16xf32>
    %c2_125 = arith.constant 2 : index
    %c0_126 = arith.constant 0 : index
    %c0_127 = arith.constant 0 : index
    %141 = vector.load %arg12[%c2_125, %c0_126, %c0_127] : memref<3x1x16xf32, #tpu.memory_space<vmem>>, vector<1x1x16xf32>
    %142 = vector.shape_cast %141 : vector<1x1x16xf32> to vector<1x16xf32>
    %143 = vector.broadcast %142 : vector<1x16xf32> to vector<8x16xf32>
    %144 = arith.addf %140, %143 : vector<8x16xf32>
    %c2_128 = arith.constant 2 : index
    %c0_129 = arith.constant 0 : index
    %c0_130 = arith.constant 0 : index
    %145 = vector.load %arg13[%c2_128, %c0_129, %c0_130] : memref<3x64x16xf32, #tpu.memory_space<vmem>>, vector<1x64x16xf32>
    %146 = vector.shape_cast %145 : vector<1x64x16xf32> to vector<64x16xf32>
    %cst_131 = arith.constant dense<0.000000e+00> : vector<8x16xf32>
    %147 = tpu.matmul %137, %146, %cst_131 {dimension_numbers = #tpu.dot_dimension_numbers<[1], [0], [0], [1], [0, 0, 1, 1], [], []>} : vector<8x64xf32>, vector<64x16xf32>, vector<8x16xf32> -> vector<8x16xf32>
    %c2_132 = arith.constant 2 : index
    %c0_133 = arith.constant 0 : index
    %c0_134 = arith.constant 0 : index
    %148 = vector.load %arg14[%c2_132, %c0_133, %c0_134] : memref<3x1x16xf32, #tpu.memory_space<vmem>>, vector<1x1x16xf32>
    %149 = vector.shape_cast %148 : vector<1x1x16xf32> to vector<1x16xf32>
    %150 = vector.broadcast %149 : vector<1x16xf32> to vector<8x16xf32>
    %151 = arith.addf %147, %150 : vector<8x16xf32>
    %152 = math.tanh %151 : vector<8x16xf32>
    %153 = math.exp %152 : vector<8x16xf32>
    %154 = arith.mulf %128, %153 : vector<8x16xf32>
    %155 = arith.addf %154, %144 : vector<8x16xf32>
    %cst_135 = arith.constant dense<0.000000e+00> : vector<8xf32>
    %156 = vector.multi_reduction <add>, %152, %cst_135 [1] : vector<8x16xf32> to vector<8xf32>
    %157 = vector.shape_cast %156 : vector<8xf32> to vector<8x1xf32>
    %158 = arith.addf %106, %157 : vector<8x1xf32>
    %c0_136 = arith.constant 0 : index
    %c0_137 = arith.constant 0 : index
    %159 = vector.load %arg16[%c0_136, %c0_137] : memref<8x16xf32, #tpu.memory_space<vmem>>, vector<8x16xf32>
    tpu.vector_store %arg16[%c0_136, %c0_137], %117 {strides = array<i32>} : memref<8x16xf32, #tpu.memory_space<vmem>>, vector<8x16xf32>,
    %c0_138 = arith.constant 0 : index
    %c0_139 = arith.constant 0 : index
    %160 = vector.load %arg17[%c0_138, %c0_139] : memref<8x16xf32, #tpu.memory_space<vmem>>, vector<8x16xf32>
    tpu.vector_store %arg17[%c0_138, %c0_139], %155 {strides = array<i32>} : memref<8x16xf32, #tpu.memory_space<vmem>>, vector<8x16xf32>,
    %c0_140 = arith.constant 0 : index
    %c0_141 = arith.constant 0 : index
    %161 = memref.load %arg15[%c0_140, %c0_141] : memref<1x1xf32, #tpu.memory_space<smem>>
    %162 = vector.broadcast %161 : f32 to vector<8x1xf32>
    %163 = arith.addf %158, %162 : vector<8x1xf32>
    %c0_142 = arith.constant 0 : index
    %c0_143 = arith.constant 0 : index
    %164 = vector.load %arg18[%c0_142, %c0_143] : memref<8x1xf32, #tpu.memory_space<vmem>>, vector<8x1xf32>
    tpu.vector_store %arg18[%c0_142, %c0_143], %163 {strides = array<i32>} : memref<8x1xf32, #tpu.memory_space<vmem>>, vector<8x1xf32>,
    return
  }
  func.func @transform_0(%arg0: i32) -> (i32, i32) {
    %c0_i32 = arith.constant 0 : i32
    %c0_i32_0 = arith.constant 0 : i32
    return %arg0, %c0_i32 : i32, i32
  }
  func.func @transform_1(%arg0: i32) -> (i32, i32) {
    %c0_i32 = arith.constant 0 : i32
    %c0_i32_0 = arith.constant 0 : i32
    return %arg0, %c0_i32 : i32, i32
  }
  func.func @transform_2(%arg0: i32) -> (i32, i32, i32) {
    %c0_i32 = arith.constant 0 : i32
    %c0_i32_0 = arith.constant 0 : i32
    %c0_i32_1 = arith.constant 0 : i32
    %c0_i32_2 = arith.constant 0 : i32
    return %c0_i32, %c0_i32_0, %c0_i32_1 : i32, i32, i32
  }
  func.func @transform_3(%arg0: i32) -> (i32, i32, i32) {
    %c0_i32 = arith.constant 0 : i32
    %c0_i32_0 = arith.constant 0 : i32
    %c0_i32_1 = arith.constant 0 : i32
    %c0_i32_2 = arith.constant 0 : i32
    return %c0_i32, %c0_i32_0, %c0_i32_1 : i32, i32, i32
  }
  func.func @transform_4(%arg0: i32) -> (i32, i32, i32) {
    %c0_i32 = arith.constant 0 : i32
    %c0_i32_0 = arith.constant 0 : i32
    %c0_i32_1 = arith.constant 0 : i32
    %c0_i32_2 = arith.constant 0 : i32
    return %c0_i32, %c0_i32_0, %c0_i32_1 : i32, i32, i32
  }
  func.func @transform_5(%arg0: i32) -> (i32, i32, i32) {
    %c0_i32 = arith.constant 0 : i32
    %c0_i32_0 = arith.constant 0 : i32
    %c0_i32_1 = arith.constant 0 : i32
    %c0_i32_2 = arith.constant 0 : i32
    return %c0_i32, %c0_i32_0, %c0_i32_1 : i32, i32, i32
  }
  func.func @transform_6(%arg0: i32) -> (i32, i32, i32) {
    %c0_i32 = arith.constant 0 : i32
    %c0_i32_0 = arith.constant 0 : i32
    %c0_i32_1 = arith.constant 0 : i32
    %c0_i32_2 = arith.constant 0 : i32
    return %c0_i32, %c0_i32_0, %c0_i32_1 : i32, i32, i32
  }
  func.func @transform_7(%arg0: i32) -> (i32, i32, i32) {
    %c0_i32 = arith.constant 0 : i32
    %c0_i32_0 = arith.constant 0 : i32
    %c0_i32_1 = arith.constant 0 : i32
    %c0_i32_2 = arith.constant 0 : i32
    return %c0_i32, %c0_i32_0, %c0_i32_1 : i32, i32, i32
  }
  func.func @transform_8(%arg0: i32) -> (i32, i32, i32) {
    %c0_i32 = arith.constant 0 : i32
    %c0_i32_0 = arith.constant 0 : i32
    %c0_i32_1 = arith.constant 0 : i32
    %c0_i32_2 = arith.constant 0 : i32
    return %c0_i32, %c0_i32_0, %c0_i32_1 : i32, i32, i32
  }
  func.func @transform_9(%arg0: i32) -> (i32, i32, i32) {
    %c0_i32 = arith.constant 0 : i32
    %c0_i32_0 = arith.constant 0 : i32
    %c0_i32_1 = arith.constant 0 : i32
    %c0_i32_2 = arith.constant 0 : i32
    return %c0_i32, %c0_i32_0, %c0_i32_1 : i32, i32, i32
  }
  func.func @transform_10(%arg0: i32) -> (i32, i32, i32) {
    %c0_i32 = arith.constant 0 : i32
    %c0_i32_0 = arith.constant 0 : i32
    %c0_i32_1 = arith.constant 0 : i32
    %c0_i32_2 = arith.constant 0 : i32
    return %c0_i32, %c0_i32_0, %c0_i32_1 : i32, i32, i32
  }
  func.func @transform_11(%arg0: i32) -> (i32, i32, i32) {
    %c0_i32 = arith.constant 0 : i32
    %c0_i32_0 = arith.constant 0 : i32
    %c0_i32_1 = arith.constant 0 : i32
    %c0_i32_2 = arith.constant 0 : i32
    return %c0_i32, %c0_i32_0, %c0_i32_1 : i32, i32, i32
  }
  func.func @transform_12(%arg0: i32) -> (i32, i32, i32) {
    %c0_i32 = arith.constant 0 : i32
    %c0_i32_0 = arith.constant 0 : i32
    %c0_i32_1 = arith.constant 0 : i32
    %c0_i32_2 = arith.constant 0 : i32
    return %c0_i32, %c0_i32_0, %c0_i32_1 : i32, i32, i32
  }
  func.func @transform_13(%arg0: i32) -> (i32, i32, i32) {
    %c0_i32 = arith.constant 0 : i32
    %c0_i32_0 = arith.constant 0 : i32
    %c0_i32_1 = arith.constant 0 : i32
    %c0_i32_2 = arith.constant 0 : i32
    return %c0_i32, %c0_i32_0, %c0_i32_1 : i32, i32, i32
  }
  func.func @transform_14(%arg0: i32) -> (i32, i32) {
    %c0_i32 = arith.constant 0 : i32
    %c0_i32_0 = arith.constant 0 : i32
    %c0_i32_1 = arith.constant 0 : i32
    return %c0_i32, %c0_i32_0 : i32, i32
  }
  func.func @transform_15(%arg0: i32) -> (i32, i32) {
    %c0_i32 = arith.constant 0 : i32
    %c0_i32_0 = arith.constant 0 : i32
    return %arg0, %c0_i32 : i32, i32
  }
  func.func @transform_16(%arg0: i32) -> (i32, i32) {
    %c0_i32 = arith.constant 0 : i32
    %c0_i32_0 = arith.constant 0 : i32
    return %arg0, %c0_i32 : i32, i32
  }
  func.func @transform_17(%arg0: i32) -> (i32, i32) {
    %c0_i32 = arith.constant 0 : i32
    %c0_i32_0 = arith.constant 0 : i32
    return %arg0, %c0_i32 : i32, i32
  }
}

</mosaic_0001>

<bundles_post_ra>
// kernel: glow_forward.1
= control target key start
LH: loop header
LB: loop body
LE: loop exit
PB: predicated region body
PF: predicated region fallthrough
CT: control target
= control target key end

     0   :  { %v2368_v0 = vmov 0.0|0.0   ;;  %vm2369_vm0 = vmmov 0   ;;  %v2370_v6 = vmov 0.0   ;;  %vm60_vm1 = vcmask 130048   ;;  %s2871_s4 = inlined_call_operand.vmem [shape: f32[3,16,16], index: 4, kind: input, shape index: {}]   ;;  %s2872_s2 = inlined_call_operand.vmem [shape: f32[3,16,16], index: 2, kind: input, shape index: {}]   ;;  %s2873_s5 = inlined_call_operand.vmem [shape: f32[3,16,16], index: 5, kind: input, shape index: {}]   ;;  %s2874_s3 = inlined_call_operand.vmem [shape: f32[3,16,16], index: 3, kind: input, shape index: {}]   ;;  %s2875_s1 = inlined_call_operand.vmem [shape: f32[8,16], index: 1, kind: input, shape index: {}, may-alias: {1,16}]   ;;  %s2876_s0 = inlined_call_operand.vmem [shape: f32[8,16], index: 0, kind: input, shape index: {}, may-alias: {0,15}]   ;;  %s2877_s8 = inlined_call_operand.vmem [shape: f32[3,16,64], index: 8, kind: input, shape index: {}]   ;;  %s2878_s10 = inlined_call_operand.vmem [shape: f32[3,64,16], index: 10, kind: input, shape index: {}]   ;;  %s2879_s12 = inlined_call_operand.vmem [shape: f32[3,64,16], index: 12, kind: input, shape index: {}]   ;;  %s2880_s6 = inlined_call_operand.vmem [shape: f32[3,1,16], index: 6, kind: input, shape index: {}]   ;;  %s2881_s9 = inlined_call_operand.vmem [shape: f32[3,1,64], index: 9, kind: input, shape index: {}]   ;;  %s2882_s13 = inlined_call_operand.vmem [shape: f32[3,1,16], index: 13, kind: input, shape index: {}]   ;;  %s2883_s7 = inlined_call_operand.vmem [shape: f32[3,1,16], index: 7, kind: input, shape index: {}]   ;;  %s2884_s11 = inlined_call_operand.vmem [shape: f32[3,1,16], index: 11, kind: input, shape index: {}]   ;;  %s2885_s15 = inlined_call_operand.vmem [shape: f32[8,16], index: 15, kind: output, shape index: {0}, may-alias: {0,15}]   ;;  %s2886_s16 = inlined_call_operand.vmem [shape: f32[8,16], index: 16, kind: output, shape index: {1}, may-alias: {1,16}]   ;;  %s2887_s14 = inlined_call_operand.<no memory space> [shape: f32[1,1], index: 14, kind: input, shape index: {}]   ;;  %s2888_s17 = inlined_call_operand.vmem [shape: f32[8,1], index: 17, kind: output, shape index: {2}]  }
   0x1   :  { %2891 = sst [smem:[#allocation3_spill]] %s2871_s4  ;;  %2236 = vmatprep.subr.bf16.mxu0 %v2368_v0  ;;  %2239 = vmatprep.subr.bf16.mxu1 %v2368_v0  ;;  %v217_v8 = vld [vmem:[%s2873_s5] sm:$0xff]  ;;  %v218_v9 = vld [vmem:[%s2873_s5 + $0x8] sm:$0xff]  ;;  %v452_v22 = vld [vmem:[%s2878_s10 + $0x10] sm:$0xff]  ;;  %vm465_vm2 = vcmask 523264   ;;  %vm1806_vm3 = vcmask 7168  }
   0x2   :  { %2892 = sst [smem:[#allocation4_spill]] %s2872_s2  ;;  %s2893_s26 = sld [smem:[#allocation3_spill]]  ;;  %2021 = vmatprep.mubr.msk.f32.mxu0 %vm2369_vm0, %v2370_v6  ;;  %2028 = vmatprep.mubr.msk.f32.mxu1 %vm2369_vm0, %v2370_v6  ;;  %v215_v10 = vld [vmem:[%s2874_s3] sm:$0xff]  ;;  %v2243_v12 = vpack.c.bf16 %v218_v9, %v217_v8  ;;  %v216_v13 = vld [vmem:[%s2874_s3 + $0x8] sm:$0xff]  ;;  %v453_v23 = vld [vmem:[%s2878_s10 + $0x18] sm:$0xff] }
   0x3   :  { %s2894_s30 = sld [smem:[#allocation4_spill]]  ;;  %v55_v11 = vld [vmem:[%s2875_s1] sm:$0xff]  ;;  %v2246_v15 = vpack.c.bf16 %v216_v13, %v215_v10  ;;  %v368_v17 = vld [vmem:[%s2877_s8 + $0x8] sm:$0xff]  ;;  %v2255_v24 = vpack.c.bf16 %v453_v23, %v452_v22  ;;  %v541_v38 = vld [vmem:[%s2879_s12 + $0x10] sm:$0xff] }
   0x4   :  { %v54_v14 = vld [vmem:[%s2876_s0] sm:$0xff]  ;;  %v451_v20 = vld [vmem:[%s2878_s10 + $0x8] sm:$0xff]  ;;  %v542_v39 = vld [vmem:[%s2879_s12 + $0x18] sm:$0xff] }
   0x5   :  { %v367_v16 = vld [vmem:[%s2877_s8] sm:$0xff]  ;;  %v455_v26 = vld [vmem:[%s2878_s10 + $0x28] sm:$0xff]  ;;  %v2267_v45 = vpack.c.bf16 %v542_v39, %v541_v38  ;;  %v456_v49 = vld [vmem:[%s2878_s10 + $0x30] sm:$0xff] }
   0x6   :  { %v2249_v18 = vpack.c.bf16 %v368_v17, %v367_v16  ;;  %v450_v19 = vld [vmem:[%s2878_s10] sm:$0xff]  ;;  %v540_v30 = vld [vmem:[%s2879_s12 + $0x8] sm:$0xff]  ;;  %v457_v50 = vld [vmem:[%s2878_s10 + $0x38] sm:$0xff] }
   0x7   :  { %v2252_v21 = vpack.c.bf16 %v451_v20, %v450_v19  ;;  %v454_v25 = vld [vmem:[%s2878_s10 + $0x20] sm:$0xff]  ;;  %v544_v47 = vld [vmem:[%s2879_s12 + $0x28] sm:$0xff]  ;;  %v545_v51 = vld [vmem:[%s2879_s12 + $0x30] sm:$0xff]  ;;  %v2261_v52 = vpack.c.bf16 %v457_v50, %v456_v49 }
   0x8   :  { %v58_v1 = vld [vmem:[%s2893_s26] sm:$0xff]  ;;  %v59_v2 = vld [vmem:[%s2893_s26 + $0x8] sm:$0xff]  ;;  %v2258_v27 = vpack.c.bf16 %v455_v26, %v454_v25  ;;  %v546_v53 = vld [vmem:[%s2879_s12 + $0x38] sm:$0xff] }
   0x9   :  { %v56_v3 = vld [vmem:[%s2894_s30] sm:$0xff]  ;;  %v2237_v4 = vpack.c.bf16 %v59_v2, %v58_v1  ;;  %v57_v5 = vld [vmem:[%s2894_s30 + $0x8] sm:$0xff]  ;;  %v2273_v54 = vpack.c.bf16 %v546_v53, %v545_v51  ;;  %v1832_v56 = vld [vmem:[%s2894_s30 + $0x10] sm:$0xff] }
   0xa   :  { %v2240_v7 = vpack.c.bf16 %v57_v5, %v56_v3  ;;  %v539_v29 = vld [vmem:[%s2879_s12] sm:$0xff]  ;;  %v1833_v57 = vld [vmem:[%s2894_s30 + $0x18] sm:$0xff]  ;;  %v1840_v63 = vld [vmem:[%s2874_s3 + $0x10] sm:$0xff] }
   0xb   :  { %2238 = vmatpush3.bf16.msra.mxu0 %v2237_v4  ;;  %v1822_v32 = vld [vmem:[%s2880_s6] ss:$0 sm:$0xff]  ;;  %v2264_v36 = vpack.c.bf16 %v540_v30, %v539_v29  ;;  %v2279_v61 = vpack.c.bf16 %v1833_v57, %v1832_v56  ;;  %v1841_v1 = vld [vmem:[%s2874_s3 + $0x18] sm:$0xff]  ;;  %v1834_v3 = vld [vmem:[%s2893_s26 + $0x10] sm:$0xff] }
   0xc   :  { %2241 = vmatpush3.bf16.msra.mxu1 %v2240_v7  ;;  %2242 = vmatprep.subr.bf16.mxu0 %v2368_v0  ;;  %v543_v46 = vld [vmem:[%s2879_s12 + $0x20] sm:$0xff]  ;;  %v2285_v2 = vpack.c.bf16 %v1841_v1, %v1840_v63  ;;  %v1835_v4 = vld [vmem:[%s2893_s26 + $0x18] sm:$0xff]  ;;  %v1842_v23 = vld [vmem:[%s2873_s5 + $0x10] sm:$0xff] }
   0xd   :  { %2245 = vmatprep.subr.bf16.mxu1 %v2368_v0  ;;  %v2270_v48 = vpack.c.bf16 %v544_v47, %v543_v46  ;;  %v1826_v55 = vld [vmem:[%s2881_s9] ss:$0 sm:$0xff]  ;;  %v2276_v5 = vpack.c.bf16 %v1835_v4, %v1834_v3  ;;  %v1848_v30 = vld [vmem:[%s2877_s8 + $0x10] sm:$0xff]  ;;  %v1865_v46 = vld [vmem:[%s2879_s12 + $0x48] sm:$0xff] }
   0xe   :  { %2022 = vmatmul.mubr.msk.f32.vlgmr.msra.gmra.mrb[0].mxu0 %vm60_vm1, %v55_v11  ;;  %v1830_v7 = vld [vmem:[%s2882_s13] ss:$0 sm:$0xff]  ;;  %v1866_v53 = vld [vmem:[%s2879_s12 + $0x50] sm:$0xff]  ;;  %v1869_v57 = vld [vmem:[%s2879_s12 + $0x68] sm:$0xff] }
   0xf   :  { %2029 = vmatmul.mubr.msk.f32.vlgmr.msra.gmra.mrb[0].mxu1 %vm60_vm1, %v54_v14  ;;  %2244 = vmatpush3.bf16.msra.mxu0 %v2243_v12  ;;  %v1825_v20 = vld [vmem:[%s2883_s7] ss:$0 sm:$0xff]  ;;  %v1871_v63 = vld [vmem:[%s2879_s12 + $0x78] sm:$0xff]  ;;  %v1878_v4 = vld [vmem:[%s2893_s26 + $0x28] sm:$0xff] }
  0x10   :  { %2247 = vmatpush3.bf16.msra.mxu1 %v2246_v15  ;;  %2035 = vmatprep.mubr.msk.f32.mxu0 %vm2369_vm0, %v2370_v6  ;;  %v1857_v39 = vld [vmem:[%s2878_s10 + $0x60] sm:$0xff] }
  0x11   :  { %2042 = vmatprep.mubr.msk.f32.mxu1 %vm2369_vm0, %v2370_v6  ;;  %2248 = vmatprep.subr.bf16.mxu0 %v2368_v0  ;;  %v1868_v56 = vld [vmem:[%s2879_s12 + $0x60] sm:$0xff] }
  0x12   :  { %2036 = vmatmul.mubr.msk.f32.vlgmr.msra.gmra.mrb[2].mxu0 %vm60_vm1, %v55_v11  ;;  %2251 = vmatprep.subr.bf16.mxu1 %v2368_v0  ;;  %v1877_v3 = vld [vmem:[%s2893_s26 + $0x20] sm:$0xff] }
  0x13   :  { %2043 = vmatmul.mubr.msk.f32.vlgmr.msra.gmra.mrb[2].mxu1 %vm60_vm1, %v54_v14  ;;  %2049 = vmatprep.mubr.msk.f32.mxu0 %vm2369_vm0, %v2370_v6 }
  0x14   :  { %2068 = vmatprep.mubr.msk.f32.mxu1 %vm2369_vm0, %v2370_v6  ;;  %2250 = vmatpush3.bf16.msra.mxu0 %v2249_v18 }
  0x15   :  { %2263 = vmatprep.subr.bf16.mxu0 %v2368_v0  ;;  %2253 = vmatpush3.bf16.msra.mxu1 %v2252_v21  ;;  %v1828_v21 = vld [vmem:[%s2884_s11] ss:$0 sm:$0xff] }
  0x16   :  { %2254 = vmatprep.subr.bf16.mxu1 %v2368_v0 }
  0x19   :  { %2256 = vmatpush3.bf16.msra.mxu1 %v2255_v24  ;;  %v1843_v24 = vld [vmem:[%s2873_s5 + $0x18] sm:$0xff] }
  0x1a   :  { %2257 = vmatprep.subr.bf16.mxu1 %v2368_v0 }
  0x1d   :  { %2259 = vmatpush3.bf16.msra.mxu1 %v2258_v27 }
  0x1e   :  { %2260 = vmatprep.subr.bf16.mxu1 %v2368_v0 }
  0x21   :  { %2262 = vmatpush3.bf16.msra.mxu1 %v2261_v52 }
  0x22   :  { %2275 = vmatprep.subr.bf16.mxu1 %v2368_v0 }
  0xe1   :  { %v130_v28 = vpop.f32.mrb[0].mxu0 }
  0xe2   :  { %v203_v31 = vpop.f32.mrb[0].mxu1  ;;  %v2023_v33 = vpop.f32.mrb[1].mxu0 }
  0xe3   :  { %v204_v34 = vadd.f32 %v203_v31, %v130_v28  ;;  %v2030_v35 = vpop.f32.mrb[1].mxu1  ;;  %v2282_v28 = vpack.c.bf16 %v1843_v24, %v1842_v23  ;;  %v1849_v31 = vld [vmem:[%s2877_s8 + $0x18] sm:$0xff]  ;;  %v1853_v33 = vld [vmem:[%s2878_s10 + $0x40] sm:$0xff] }
  0xe5   :  { %v214_v37 = vadd.f32 %v1822_v32, %v204_v34  ;;  %v285_v40 = vpop.f32.mrb[2].mxu0  ;;  %v2288_v32 = vpack.c.bf16 %v1849_v31, %v1848_v30  ;;  %v1854_v34 = vld [vmem:[%s2878_s10 + $0x48] sm:$0xff]  ;;  %v1839_v30 = vld [vmem:[%s2880_s6 + $0x1] ss:$0 sm:$0xff] }
  0xe6   :  { %v2037_v41 = vpop.f32.mrb[3].mxu0  ;;  %v355_v42 = vpop.f32.mrb[2].mxu1  ;;  %v2291_v35 = vpack.c.bf16 %v1854_v34, %v1853_v33  ;;  %v1862_v31 = vld [vmem:[%s2884_s11 + $0x1] ss:$0 sm:$0xff]  ;;  %v1884_v34 = vld [vmem:[%s2874_s3 + $0x28] sm:$0xff] }
  0xe7   :  { %2050 = vmatmul.mubr.msk.f32.vlgmr.msra.gmra.mrb[4].mxu0 %vm60_vm1, %v214_v37  ;;  %v2557_v43 = vadd.f32 %v355_v42, %v285_v40  ;;  %v2044_v44 = vpop.f32.mrb[3].mxu1  ;;  %v1858_v40 = vld [vmem:[%s2878_s10 + $0x68] sm:$0xff]  ;;  %v1883_v33 = vld [vmem:[%s2874_s3 + $0x20] sm:$0xff] }
  0xe8   :  { %2265 = vmatpush3.bf16.msra.mxu0 %v2264_v36  ;;  %2087 = vmatprep.mubr.msk.f32.mxu0 %vm2369_vm0, %v2370_v6  ;;  %v1855_v36 = vld [vmem:[%s2878_s10 + $0x50] sm:$0xff]  ;;  %v2297_v41 = vpack.c.bf16 %v1858_v40, %v1857_v39  ;;  %v1891_v40 = vld [vmem:[%s2877_s8 + $0x20] sm:$0xff] }
  0xe9   :  { %2266 = vmatprep.subr.bf16.mxu0 %v2368_v0  ;;  %v366_v22 = vadd.f32 %v1825_v20, %v2557_v43 }
  0xec   :  { %2268 = vmatpush3.bf16.msra.mxu0 %v2267_v45  ;;  %v1864_v45 = vld [vmem:[%s2879_s12 + $0x40] sm:$0xff] }
  0xed   :  { %2269 = vmatprep.subr.bf16.mxu0 %v2368_v0  ;;  %v2303_v51 = vpack.c.bf16 %v1865_v46, %v1864_v45  ;;  %v1898_v46 = vld [vmem:[%s2878_s10 + $0x90] sm:$0xff] }
  0xf0   :  { %2271 = vmatpush3.bf16.msra.mxu0 %v2270_v48  ;;  %v1847_v48 = vld [vmem:[%s2883_s7 + $0x1] ss:$0 sm:$0xff] }
  0xf1   :  { %2272 = vmatprep.subr.bf16.mxu0 %v2368_v0 }
  0xf4   :  { %2274 = vmatpush3.bf16.msra.mxu0 %v2273_v54  ;;  %v1867_v54 = vld [vmem:[%s2879_s12 + $0x58] sm:$0xff] }
  0xf5   :  { %2278 = vmatprep.subr.bf16.mxu0 %v2368_v0 }
 0x1ba   :  { %v445_v58 = vpop.f32.mrb[4].mxu0 }
 0x1bb   :  { %v446_v59 = vadd.f32 %v1826_v55, %v445_v58  ;;  %v2051_v60 = vpop.f32.mrb[5].mxu0  ;;  %v2306_v55 = vpack.c.bf16 %v1867_v54, %v1866_v53  ;;  %v2309_v58 = vpack.c.bf16 %v1869_v57, %v1868_v56  ;;  %v1908_v53 = vld [vmem:[%s2879_s12 + $0x88] sm:$0xff] }
 0x1bc   :  { %v1860_v60 = vld [vmem:[%s2878_s10 + $0x78] sm:$0xff] }
 0x1bd   :  { %v449_v62 = vmax.f32 %v446_v59, 0.0  ;;  %v1859_v59 = vld [vmem:[%s2878_s10 + $0x70] sm:$0xff] }
 0x1bf   :  { %2069 = vmatmul.mubr.msk.f32.vlgmr.msra.gmra.mrb[4].mxu1 %vm465_vm2, %v449_v62  ;;  %2088 = vmatmul.mubr.msk.f32.vlgmr.msra.gmra.mrb[6].mxu0 %vm465_vm2, %v449_v62  ;;  %v2300_v62 = vpack.c.bf16 %v1860_v60, %v1859_v59  ;;  %v1909_v60 = vld [vmem:[%s2879_s12 + $0x90] sm:$0xff] }
 0x1c0   :  { %2280 = vmatpush3.bf16.msra.mxu0 %v2279_v61  ;;  %2101 = vmatprep.mubr.msk.f32.mxu0 %vm2369_vm0, %v2370_v6  ;;  %v1870_v61 = vld [vmem:[%s2879_s12 + $0x70] sm:$0xff] }
 0x1c1   :  { %2284 = vmatprep.subr.bf16.mxu0 %v2368_v0  ;;  %2094 = vmatprep.mubr.msk.f32.mxu1 %vm2369_vm0, %v2370_v6  ;;  %v2312_v1 = vpack.c.bf16 %v1871_v63, %v1870_v61  ;;  %v1910_v61 = vld [vmem:[%s2879_s12 + $0x98] sm:$0xff] }
 0x1c2   :  { %2277 = vmatpush3.bf16.msra.mxu1 %v2276_v5 }
 0x1c3   :  { %2102 = vmatmul.mubr.msk.f32.vlgmr.msra.gmra.mrb[8].mxu0 %vm60_vm1, %v214_v37  ;;  %2281 = vmatprep.subr.bf16.mxu1 %v2368_v0 }
 0x1c4   :  { %2286 = vmatpush3.bf16.msra.mxu0 %v2285_v2  ;;  %2115 = vmatprep.mubr.msk.f32.mxu0 %vm2369_vm0, %v2370_v6  ;;  %v1851_v2 = vld [vmem:[%s2881_s9 + $0x1] ss:$0 sm:$0xff] }
 0x1c5   :  { %2290 = vmatprep.subr.bf16.mxu0 %v2368_v0 }
 0x1c7   :  { %2116 = vmatmul.mubr.msk.f32.vlgmr.msra.gmra.mrb[10].mxu0 %vm60_vm1, %v214_v37  ;;  %v1856_v37 = vld [vmem:[%s2878_s10 + $0x58] sm:$0xff] }
 0x1c8   :  { %2141 = vmatprep.mubr.msk.f32.mxu0 %vm2369_vm0, %v2370_v6  ;;  %2292 = vmatpush3.bf16.msra.mxu0 %v2291_v35  ;;  %v2294_v38 = vpack.c.bf16 %v1856_v37, %v1855_v36 }
 0x1c9   :  { %2293 = vmatprep.subr.bf16.mxu0 %v2368_v0 }
 0x1cc   :  { %2295 = vmatpush3.bf16.msra.mxu0 %v2294_v38  ;;  %v2324_v38 = vpack.c.bf16 %v1884_v34, %v1883_v33 }
 0x1cd   :  { %2296 = vmatprep.subr.bf16.mxu0 %v2368_v0 }
 0x1d0   :  { %2298 = vmatpush3.bf16.msra.mxu0 %v2297_v41  ;;  %v1892_v41 = vld [vmem:[%s2877_s8 + $0x28] sm:$0xff] }
 0x1d1   :  { %2299 = vmatprep.subr.bf16.mxu0 %v2368_v0 }
 0x1d4   :  { %2301 = vmatpush3.bf16.msra.mxu0 %v2300_v62 }
 0x1d5   :  { %2314 = vmatprep.subr.bf16.mxu0 %v2368_v0 }
 0x292   :  { %v535_v8 = vpop.f32.mrb[4].mxu1  ;;  %v620_v9 = vpop.f32.mrb[6].mxu0 }
 0x293   :  { %v621_v10 = vadd.f32 %v1830_v7, %v620_v9  ;;  %v2070_v11 = vpop.f32.mrb[5].mxu1  ;;  %v2089_v12 = vpop.f32.mrb[7].mxu0  ;;  %v536_v26 = vadd.f32 %v1828_v21, %v535_v8  ;;  %v2315_v9 = vpack.c.bf16 %v1878_v4, %v1877_v3  ;;  %v1911_v3 = vld [vmem:[%s2879_s12 + $0xa0] sm:$0xff]  ;;  %v1912_v4 = vld [vmem:[%s2879_s12 + $0xa8] sm:$0xff] }
 0x294   :  { %v1885_v11 = vld [vmem:[%s2873_s5 + $0x20] sm:$0xff]  ;;  %v1886_v12 = vld [vmem:[%s2873_s5 + $0x28] sm:$0xff] }
 0x295   :  { %2356 = vtanh.f32 %v621_v10 }
 0x296   :  { %v778_v13 = vpop.f32.mrb[8].mxu0 }
 0x297   :  { %v2103_v14 = vpop.f32.mrb[9].mxu0 }
 0x298   :  { %v1875_v14 = vld [vmem:[%s2894_s30 + $0x20] sm:$0xff] }
 0x29a   :  { %v933_v15 = vpop.f32.mrb[10].mxu0 }
 0x29b   :  { %v2117_v16 = vpop.f32.mrb[11].mxu0 }
 0x29f   :  { %v2357_v17 = vpop.eup %2356 }
 0x2a0   :  { %v625_v18 = vmul.f32 1.442695, %v2357_v17  ;;  %v629_v19 = vsel %vm60_vm1, %v2357_v17, 0.0  ;;  %v1873_v17 = vld [vmem:[%s2882_s13 + $0x1] ss:$0 sm:$0xff] }
 0x2a1   :  { %630 = vadd.xlane.f32.xlu0 %v629_v19 }
 0x2a2   :  { %2358 = vpow2.f32 %v625_v18 }
 0x2ac   :  { %v2359_v25 = vpop.eup %2358 }
 0x2ad   :  { %v627_v27 = vmul.f32 %v2359_v25, %v366_v22 }
 0x2af   :  { %v628_v29 = vadd.f32 %v627_v27, %v536_v26 }
 0x2b1   :  { %2095 = vmatmul.mubr.msk.f32.vlgmr.msra.gmra.mrb[6].mxu1 %vm60_vm1, %v628_v29 }
 0x2b2   :  { %2283 = vmatpush3.bf16.msra.mxu1 %v2282_v28  ;;  %2108 = vmatprep.mubr.msk.f32.mxu1 %vm2369_vm0, %v2370_v6 }
 0x2b3   :  { %2287 = vmatprep.subr.bf16.mxu1 %v2368_v0 }
 0x2b5   :  { %2109 = vmatmul.mubr.msk.f32.vlgmr.msra.gmra.mrb[8].mxu1 %vm60_vm1, %v628_v29 }
 0x2b6   :  { %2122 = vmatprep.mubr.msk.f32.mxu1 %vm2369_vm0, %v2370_v6  ;;  %2289 = vmatpush3.bf16.msra.mxu1 %v2288_v32 }
 0x2b7   :  { %2302 = vmatprep.subr.bf16.mxu1 %v2368_v0 }
 0x384   :  { %v708_v42 = vpop.f32.mrb[6].mxu1 }
 0x385   :  { %v2672_v43 = vadd.f32 %v778_v13, %v708_v42  ;;  %v2096_v44 = vpop.f32.mrb[7].mxu1  ;;  %v2321_v13 = vpack.c.bf16 %v1886_v12, %v1885_v11  ;;  %v2327_v42 = vpack.c.bf16 %v1892_v41, %v1891_v40 }
 0x386   :  { %v1897_v44 = vld [vmem:[%s2878_s10 + $0x88] sm:$0xff] }
 0x387   :  { %v790_v32 = vadd.f32 %v1839_v30, %v2672_v43  ;;  %v1896_v43 = vld [vmem:[%s2878_s10 + $0x80] sm:$0xff] }
 0x388   :  { %v863_v47 = vpop.f32.mrb[8].mxu1  ;;  %v2330_v45 = vpack.c.bf16 %v1897_v44, %v1896_v43 }
 0x389   :  { %v934_v49 = vadd.f32 %v933_v15, %v863_v47  ;;  %v2110_v50 = vpop.f32.mrb[9].mxu1  ;;  %v1876_v15 = vld [vmem:[%s2894_s30 + $0x28] sm:$0xff]  ;;  %v1899_v47 = vld [vmem:[%s2878_s10 + $0x98] sm:$0xff] }
 0x38a   :  { %v2318_v16 = vpack.c.bf16 %v1876_v15, %v1875_v14  ;;  %v1901_v50 = vld [vmem:[%s2878_s10 + $0xa8] sm:$0xff] }
 0x38b   :  { %v945_v52 = vadd.f32 %v1847_v48, %v934_v49  ;;  %v2333_v48 = vpack.c.bf16 %v1899_v47, %v1898_v46  ;;  %v1900_v49 = vld [vmem:[%s2878_s10 + $0xa0] sm:$0xff] }
 0x38d   :  { %2123 = vmatmul.mubr.msk.f32.vlgmr.msra.gmra.mrb[10].mxu1 %vm60_vm1, %v945_v52 }
 0x38e   :  { %2304 = vmatpush3.bf16.msra.mxu1 %v2303_v51  ;;  %2160 = vmatprep.mubr.msk.f32.mxu1 %vm2369_vm0, %v2370_v6  ;;  %v2336_v51 = vpack.c.bf16 %v1901_v50, %v1900_v49 }
 0x38f   :  { %2305 = vmatprep.subr.bf16.mxu1 %v2368_v0 }
 0x392   :  { %2307 = vmatpush3.bf16.msra.mxu1 %v2306_v55  ;;  %v1882_v55 = vld [vmem:[%s2880_s6 + $0x2] ss:$0 sm:$0xff] }
 0x393   :  { %2308 = vmatprep.subr.bf16.mxu1 %v2368_v0 }
 0x396   :  { %2310 = vmatpush3.bf16.msra.mxu1 %v2309_v58 }
 0x397   :  { %2311 = vmatprep.subr.bf16.mxu1 %v2368_v0 }
 0x39a   :  { %2313 = vmatpush3.bf16.msra.mxu1 %v2312_v1 }
 0x39b   :  { %2317 = vmatprep.subr.bf16.mxu1 %v2368_v0 }
 0x460   :  { %v1026_v5 = vpop.f32.mrb[10].mxu1 }
 0x461   :  { %v1027_v7 = vadd.f32 %v1851_v2, %v1026_v5  ;;  %v2124_v8 = vpop.f32.mrb[11].mxu1  ;;  %v2345_v2 = vpack.c.bf16 %v1910_v61, %v1909_v60  ;;  %v2348_v5 = vpack.c.bf16 %v1912_v4, %v1911_v3 }
 0x462   :  { %v1913_v8 = vld [vmem:[%s2879_s12 + $0xb0] sm:$0xff] }
 0x463   :  { %v1030_v10 = vmax.f32 %v1027_v7, 0.0  ;;  %v1903_v7 = vld [vmem:[%s2878_s10 + $0xb8] sm:$0xff] }
 0x465   :  { %2142 = vmatmul.mubr.msk.f32.vlgmr.msra.gmra.mrb[12].mxu0 %vm465_vm2, %v1030_v10  ;;  %2161 = vmatmul.mubr.msk.f32.vlgmr.msra.gmra.mrb[12].mxu1 %vm465_vm2, %v1030_v10  ;;  %v1914_v10 = vld [vmem:[%s2879_s12 + $0xb8] sm:$0xff] }
 0x466   :  { %2316 = vmatpush3.bf16.msra.mxu0 %v2315_v9  ;;  %2167 = vmatprep.mubr.msk.f32.mxu0 %vm2369_vm0, %v2370_v6  ;;  %v2351_v11 = vpack.c.bf16 %v1914_v10, %v1913_v8 }
 0x467   :  { %2320 = vmatprep.subr.bf16.mxu0 %v2368_v0  ;;  %2174 = vmatprep.mubr.msk.f32.mxu1 %vm2369_vm0, %v2370_v6 }
 0x468   :  { %2319 = vmatpush3.bf16.msra.mxu1 %v2318_v16  ;;  %v1916_v16 = vld [vmem:[%s2882_s13 + $0x2] ss:$0 sm:$0xff] }
 0x469   :  { %2168 = vmatmul.mubr.msk.f32.vlgmr.msra.gmra.mrb[14].mxu0 %vm60_vm1, %v945_v52  ;;  %2323 = vmatprep.subr.bf16.mxu1 %v2368_v0 }
 0x46a   :  { %2322 = vmatpush3.bf16.msra.mxu0 %v2321_v13  ;;  %2181 = vmatprep.mubr.msk.f32.mxu0 %vm2369_vm0, %v2370_v6 }
 0x46b   :  { %2326 = vmatprep.subr.bf16.mxu0 %v2368_v0 }
 0x46d   :  { %2182 = vmatmul.mubr.msk.f32.vlgmr.msra.gmra.mrb[16].mxu0 %vm60_vm1, %v945_v52  ;;  %v1907_v52 = vld [vmem:[%s2879_s12 + $0x80] sm:$0xff] }
 0x46e   :  { %2195 = vmatprep.mubr.msk.f32.mxu0 %vm2369_vm0, %v2370_v6  ;;  %2328 = vmatpush3.bf16.msra.mxu0 %v2327_v42  ;;  %v2342_v58 = vpack.c.bf16 %v1908_v53, %v1907_v52 }
 0x46f   :  { %2341 = vmatprep.subr.bf16.mxu0 %v2368_v0 }
 0x538   :  { %v1117_v18 = vpop.f32.mrb[12].mxu0  ;;  %v1204_v19 = vpop.f32.mrb[12].mxu1 }
 0x539   :  { %v1205_v20 = vadd.f32 %v1873_v17, %v1204_v19  ;;  %v2143_v21 = vpop.f32.mrb[13].mxu0  ;;  %v2162_v22 = vpop.f32.mrb[13].mxu1  ;;  %v1118_v36 = vadd.f32 %v1862_v31, %v1117_v18 }
 0x53b   :  { %2360 = vtanh.f32 %v1205_v20 }
 0x53c   :  { %v1289_v23 = vpop.f32.mrb[14].mxu0 }
 0x53d   :  { %v2169_v24 = vpop.f32.mrb[15].mxu0 }
 0x540   :  { %v1447_v25 = vpop.f32.mrb[16].mxu0 }
 0x541   :  { %v2183_v26 = vpop.f32.mrb[17].mxu0 }
 0x542   :  { %v1905_v26 = vld [vmem:[%s2884_s11 + $0x2] ss:$0 sm:$0xff] }
 0x545   :  { %v2361_v27 = vpop.eup %2360 }
 0x546   :  { %v1209_v28 = vmul.f32 1.442695, %v2361_v27  ;;  %v1213_v29 = vsel %vm60_vm1, %v2361_v27, 0.0 }
 0x547   :  { %1214 = vadd.xlane.f32.xlu0 %v1213_v29 }
 0x548   :  { %2362 = vpow2.f32 %v1209_v28 }
 0x552   :  { %v2363_v35 = vpop.eup %2362 }
 0x553   :  { %v1211_v37 = vmul.f32 %v2363_v35, %v790_v32  ;;  %v631_v32 = vpop.xlane.xlu0 %630  ;;  %v1804_v35 = vstv %s2887_s14 }
 0x555   :  { %v1212_v39 = vadd.f32 %v1211_v37, %v1118_v36 }
 0x557   :  { %2175 = vmatmul.mubr.msk.f32.vlgmr.msra.gmra.mrb[14].mxu1 %vm60_vm1, %v1212_v39 }
 0x558   :  { %2325 = vmatpush3.bf16.msra.mxu1 %v2324_v38  ;;  %2188 = vmatprep.mubr.msk.f32.mxu1 %vm2369_vm0, %v2370_v6 }
 0x559   :  { %2329 = vmatprep.subr.bf16.mxu1 %v2368_v0 }
 0x55b   :  { %2189 = vmatmul.mubr.msk.f32.vlgmr.msra.gmra.mrb[16].mxu1 %vm60_vm1, %v1212_v39 }
 0x55c   :  { %2214 = vmatprep.mubr.msk.f32.mxu1 %vm2369_vm0, %v2370_v6  ;;  %2331 = vmatpush3.bf16.msra.mxu1 %v2330_v45 }
 0x55d   :  { %2332 = vmatprep.subr.bf16.mxu1 %v2368_v0 }
 0x560   :  { %2334 = vmatpush3.bf16.msra.mxu1 %v2333_v48 }
 0x561   :  { %2335 = vmatprep.subr.bf16.mxu1 %v2368_v0 }
 0x564   :  { %2337 = vmatpush3.bf16.msra.mxu1 %v2336_v51 }
 0x565   :  { %2338 = vmatprep.subr.bf16.mxu1 %v2368_v0 }
 0x5d4   :  { %v1215_v33 = vpop.xlane.xlu0 %1214 }
 0x5d5   :  { %v1216_v34 = vadd.f32 %v1215_v33, %v631_v32 }
 0x62a   :  { %v1362_v54 = vpop.f32.mrb[14].mxu1 }
 0x62b   :  { %v1363_v56 = vadd.f32 %v1362_v54, %v1289_v23  ;;  %v2176_v57 = vpop.f32.mrb[15].mxu1 }
 0x62d   :  { %v1374_v59 = vadd.f32 %v1882_v55, %v1363_v56 }
 0x62e   :  { %v1517_v62 = vpop.f32.mrb[16].mxu1 }
 0x62f   :  { %1801 = vst.msk [vmem:[%s2885_s15] sm:$0xff] %vm60_vm1, %v1374_v59  ;;  %v1518_v63 = vadd.f32 %v1517_v62, %v1447_v25  ;;  %v2190_v1 = vpop.f32.mrb[17].mxu1  ;;  %2196 = vmatmul.mubr.msk.f32.vlgmr.msra.gmra.mrb[18].mxu0 %vm60_vm1, %v1374_v59  ;;  %v1890_v25 = vld [vmem:[%s2883_s7 + $0x2] ss:$0 sm:$0xff] }
 0x630   :  { %2343 = vmatpush3.bf16.msra.mxu0 %v2342_v58  ;;  %2233 = vmatprep.mubr.msk.f32.mxu0 %vm2369_vm0, %v2370_v6  ;;  %v1902_v6 = vld [vmem:[%s2878_s10 + $0xb0] sm:$0xff] }
 0x631   :  { %2344 = vmatprep.subr.bf16.mxu0 %v2368_v0  ;;  %v2339_v9 = vpack.c.bf16 %v1903_v7, %v1902_v6  ;;  %v1529_v27 = vadd.f32 %v1890_v25, %v1518_v63 }
 0x633   :  { %2340 = vmatpush3.bf16.msra.mxu1 %v2339_v9 }
 0x634   :  { %2346 = vmatpush3.bf16.msra.mxu0 %v2345_v2 }
 0x635   :  { %2347 = vmatprep.subr.bf16.mxu0 %v2368_v0 }
 0x638   :  { %2349 = vmatpush3.bf16.msra.mxu0 %v2348_v5 }
 0x639   :  { %2350 = vmatprep.subr.bf16.mxu0 %v2368_v0  ;;  %v1894_v0 = vld [vmem:[%s2881_s9 + $0x2] ss:$0 sm:$0xff] }
 0x63c   :  { %2352 = vmatpush3.bf16.msra.mxu0 %v2351_v11 }
 0x702   :  { %v1610_v12 = vpop.f32.mrb[18].mxu0 }
 0x703   :  { %v1611_v13 = vadd.f32 %v1894_v0, %v1610_v12  ;;  %v2197_v14 = vpop.f32.mrb[19].mxu0 }
 0x705   :  { %v1614_v15 = vmax.f32 %v1611_v13, 0.0 }
 0x707   :  { %2215 = vmatmul.mubr.msk.f32.vlgmr.msra.gmra.mrb[18].mxu1 %vm465_vm2, %v1614_v15  ;;  %2234 = vmatmul.mubr.msk.f32.vlgmr.msra.gmra.mrb[20].mxu0 %vm465_vm2, %v1614_v15 }
 0x7da   :  { %v1701_v17 = vpop.f32.mrb[18].mxu1  ;;  %v1788_v18 = vpop.f32.mrb[20].mxu0 }
 0x7db   :  { %v1789_v19 = vadd.f32 %v1916_v16, %v1788_v18  ;;  %v2216_v20 = vpop.f32.mrb[19].mxu1  ;;  %v2235_v21 = vpop.f32.mrb[21].mxu0  ;;  %v1702_v29 = vadd.f32 %v1905_v26, %v1701_v17 }
 0x7dd   :  { %2364 = vtanh.f32 %v1789_v19 }
 0x7e7   :  { %v2365_v22 = vpop.eup %2364 }
 0x7e8   :  { %v1793_v23 = vmul.f32 1.442695, %v2365_v22  ;;  %v1797_v24 = vsel %vm60_vm1, %v2365_v22, 0.0 }
 0x7e9   :  { %1798 = vadd.xlane.f32.xlu1 %v1797_v24 }
 0x7ea   :  { %2366 = vpow2.f32 %v1793_v23 }
 0x7f4   :  { %v2367_v28 = vpop.eup %2366 }
 0x7f5   :  { %v1795_v30 = vmul.f32 %v2367_v28, %v1529_v27 }
 0x7f7   :  { %v1796_v31 = vadd.f32 %v1795_v30, %v1702_v29 }
 0x7f9   :  { %1802 = vst.msk [vmem:[%s2886_s16] sm:$0xff] %vm60_vm1, %v1796_v31 }
 0x876   :  { %v1799_v36 = vpop.xlane.xlu1 %1798 }
 0x877   :  { %v1800_v37 = vadd.f32 %v1799_v36, %v1216_v34 }
 0x879   :  { %v1805_v38 = vadd.f32 %v1804_v35, %v1800_v37 }
 0x87b   :  { %1807 = vst.msk [vmem:[%s2888_s17] sm:$0xff] %vm1806_vm3, %v1805_v38 }

</bundles_post_ra>
